<compile_context>
chip_gen: v6e
topology: v6e:2x2x1
jax: 0.10.0
libtpu: 0.0.40
codegen_flags: <defaults>
</compile_context>

<pallas_src>
import functools
import math

import jax
import jax.numpy as jnp
from jax import lax
from jax.experimental import pallas as pl
from jax.experimental.pallas import tpu as pltpu


# ---------------------------------------------------------------------------
# Single fused kernel.
# ---------------------------------------------------------------------------
def fused_mha_kernel(x_ref, wqkv_ref, bqkv_ref, wo_ref, bo_ref, o_ref, attn_ref,
                     *, B, S, H, hd):
    D = H * hd

    # Fused QKV projection (scale already folded into the Wq/bq block).
    qkv = (
        jnp.dot(x_ref[...], wqkv_ref[...], preferred_element_type=jnp.float32)
        + bqkv_ref[...]
    )                                                   # (B*S, 3D)
    qp = qkv[:, 0:D]
    kp = qkv[:, D:2 * D]
    vp = qkv[:, 2 * D:3 * D]

    # Per-(batch, head) attention, fully unrolled (B*H = 8 tiny tiles).
    for b in range(B):
        r0 = b * S
        for h in range(H):
            c0 = h * hd
            q_bh = qp[r0:r0 + S, c0:c0 + hd]            # (S, hd), pre-scaled
            k_bh = kp[r0:r0 + S, c0:c0 + hd]            # (S, hd)
            v_bh = vp[r0:r0 + S, c0:c0 + hd]            # (S, hd)
            # QK^T: contract last dims directly (no materialized transpose).
            s = lax.dot_general(
                q_bh, k_bh, (((1,), (1,)), ((), ())),
                preferred_element_type=jnp.float32,
            )                                           # (S, S)
            m = jnp.max(s, axis=-1, keepdims=True)
            p = jnp.exp(s - m)
            denom = jnp.sum(p, axis=-1, keepdims=True)
            p = p * pl.reciprocal(denom, approx=True)   # EUP, not VPU divide
            attn_ref[r0:r0 + S, c0:c0 + hd] = jnp.dot(
                p, v_bh, preferred_element_type=jnp.float32
            )

    # Output projection, still in VMEM; single store of (B*S, D).
    o_ref[...] = (
        jnp.dot(attn_ref[...], wo_ref[...], preferred_element_type=jnp.float32)
        + bo_ref[...]
    )


# ---------------------------------------------------------------------------
# One-time parameter packing (hoisted out of the forward path).
# The attention scale 1/sqrt(head_dim) is folded into the Wq / bq block so the
# kernel never multiplies the scores by it.
# ---------------------------------------------------------------------------
def pack_params(params, num_heads):
    wq_t = jnp.asarray(params["wq"], jnp.float32).T
    wk_t = jnp.asarray(params["wk"], jnp.float32).T
    wv_t = jnp.asarray(params["wv"], jnp.float32).T
    D = wq_t.shape[0]
    hd = D // num_heads
    scale = 1.0 / math.sqrt(hd)

    w_qkv = jnp.zeros((3 * D, 3 * D), jnp.float32)
    w_qkv = w_qkv.at[0:D, 0:D].set(wq_t * scale)
    w_qkv = w_qkv.at[D:2 * D, D:2 * D].set(wk_t)
    w_qkv = w_qkv.at[2 * D:3 * D, 2 * D:3 * D].set(wv_t)
    b_qkv = jnp.concatenate(
        [jnp.asarray(params["bq"], jnp.float32) * scale,
         jnp.asarray(params["bk"], jnp.float32),
         jnp.asarray(params["bv"], jnp.float32)]
    ).reshape(1, 3 * D)
    wo_t = jnp.asarray(params["wo"], jnp.float32).T
    bo = jnp.asarray(params["bo"], jnp.float32).reshape(1, D)
    return {"w_qkv": w_qkv, "b_qkv": b_qkv, "wo_t": wo_t, "bo": bo}


# ---------------------------------------------------------------------------
# Forward wrapper: one pallas_call, one program.
# ---------------------------------------------------------------------------
@functools.partial(jax.jit, static_argnames=("num_heads",))
def multi_head_attention(Q, K, V, packed, *, num_heads):
    B, S, D = Q.shape
    hd = D // num_heads
    N = B * S
    # Concatenate the (distinct) Q/K/V inputs along lanes so the block-diagonal
    # packed weight does the whole QKV projection in one matmul.
    x_cat = jnp.concatenate(
        [Q.reshape(N, D), K.reshape(N, D), V.reshape(N, D)], axis=1
    ).astype(jnp.float32)                                # (N, 3D)

    kernel = functools.partial(fused_mha_kernel, B=B, S=S, H=num_heads, hd=hd)
    out = pl.pallas_call(
        kernel,
        out_shape=jax.ShapeDtypeStruct((N, D), jnp.float32),
        grid=(1,),
        in_specs=[
            pl.BlockSpec((N, 3 * D), lambda i: (0, 0)),       # x_cat
            pl.BlockSpec((3 * D, 3 * D), lambda i: (0, 0)),   # packed W_qkv
            pl.BlockSpec((1, 3 * D), lambda i: (0, 0)),       # packed b_qkv
            pl.BlockSpec((D, D), lambda i: (0, 0)),           # Wo^T
            pl.BlockSpec((1, D), lambda i: (0, 0)),           # bo
        ],
        out_specs=pl.BlockSpec((N, D), lambda i: (0, 0)),
        scratch_shapes=[pltpu.VMEM((N, D), jnp.float32)],     # merged-head attn
        compiler_params=pltpu.CompilerParams(
            dimension_semantics=("arbitrary",)),
    )(x_cat, packed["w_qkv"], packed["b_qkv"], packed["wo_t"], packed["bo"])
    return out.reshape(B, S, D)


# ---------------------------------------------------------------------------
# Pure-JAX reference (uses the UNPACKED params, so it also validates the
# packing / scale-folding done in pack_params).
# ---------------------------------------------------------------------------
def reference_mha(Q, K, V, params, num_heads):
    B, S, D = Q.shape
    hd = D // num_heads
    hp = jax.lax.Precision.HIGHEST

    def lin(x, w, b):
        return jnp.matmul(x, w.T, precision=hp) + b

    def split(x):
        return x.reshape(B, S, num_heads, hd).transpose(0, 2, 1, 3)

    q = split(lin(Q, params["wq"], params["bq"]))
    k = split(lin(K, params["wk"], params["bk"]))
    v = split(lin(V, params["wv"], params["bv"]))
    s = jnp.matmul(q, jnp.swapaxes(k, -2, -1), precision=hp) / math.sqrt(hd)
    p = jax.nn.softmax(s, axis=-1)
    o = jnp.matmul(p, v, precision=hp)
    o = o.transpose(0, 2, 1, 3).reshape(B, S, D)
    return lin(o, params["wo"], params["bo"])


def init_params(key, d_model):
    """Deterministic nn.Linear-style init: U(-1/sqrt(fan_in), 1/sqrt(fan_in))."""
    bound = 1.0 / math.sqrt(d_model)
    names = ["wq", "bq", "wk", "bk", "wv", "bv", "wo", "bo"]
    keys = jax.random.split(key, len(names))
    params = {}
    for name, k in zip(names, keys):
        shape = (d_model, d_model) if name.startswith("w") else (d_model,)
        params[name] = jax.random.uniform(
            k, shape, jnp.float32, minval=-bound, maxval=bound
        )
    return params


if __name__ == "__main__":
    d_model = 32
    num_heads = 4
    batch = 2
    seq = 8

    key = jax.random.PRNGKey(0)
    kq, kk, kv, kp = jax.random.split(key, 4)
    Q = jax.random.normal(kq, (batch, seq, d_model), jnp.float32)
    K = jax.random.normal(kk, (batch, seq, d_model), jnp.float32)
    V = jax.random.normal(kv, (batch, seq, d_model), jnp.float32)
    params = init_params(kp, d_model)

    packed = pack_params(params, num_heads)   # done once, outside forward path
    out = multi_head_attention(Q, K, V, packed, num_heads=num_heads)
    out = jax.block_until_ready(out)

    ref = reference_mha(Q, K, V, params, num_heads)
    assert out.shape == (batch, seq, d_model)
    assert jnp.allclose(out, ref, atol=5e-3, rtol=5e-3), "mismatch vs reference"

    print("KERNEL_OK")
</pallas_src>

<mosaic_0001>
module attributes {stable_mosaic.version = 11 : i64} {
  func.func @fused_mha_kernel(%arg0: i32, %arg1: memref<16x96xf32, #tpu.memory_space<vmem>>, %arg2: memref<96x96xf32, #tpu.memory_space<vmem>>, %arg3: memref<1x96xf32, #tpu.memory_space<vmem>>, %arg4: memref<32x32xf32, #tpu.memory_space<vmem>>, %arg5: memref<1x32xf32, #tpu.memory_space<vmem>>, %arg6: memref<16x32xf32, #tpu.memory_space<vmem>>, %arg7: memref<16x32xf32, #tpu.memory_space<vmem>>) attributes {dimension_semantics = [#tpu.dimension_semantics<arbitrary>], iteration_bounds = array<i64: 1>, scalar_prefetch = 0 : i64, scratch_operands = 1 : i64, tpu.core_type = #tpu.core_type<tc>, window_params = [{pipeline_mode = #tpu.pipeline_mode<synchronous>, transform_indices = @transform_0, window_bounds = array<i64: 16, 96>}, {pipeline_mode = #tpu.pipeline_mode<synchronous>, transform_indices = @transform_1, window_bounds = array<i64: 96, 96>}, {pipeline_mode = #tpu.pipeline_mode<synchronous>, transform_indices = @transform_2, window_bounds = array<i64: 1, 96>}, {pipeline_mode = #tpu.pipeline_mode<synchronous>, transform_indices = @transform_3, window_bounds = array<i64: 32, 32>}, {pipeline_mode = #tpu.pipeline_mode<synchronous>, transform_indices = @transform_4, window_bounds = array<i64: 1, 32>}, {pipeline_mode = #tpu.pipeline_mode<synchronous>, transform_indices = @transform_5, window_bounds = array<i64: 16, 32>}]} {
    %c0 = arith.constant 0 : index
    %c0_0 = arith.constant 0 : index
    %0 = vector.load %arg1[%c0, %c0_0] : memref<16x96xf32, #tpu.memory_space<vmem>>, vector<16x96xf32>
    %c0_1 = arith.constant 0 : index
    %c0_2 = arith.constant 0 : index
    %1 = vector.load %arg2[%c0_1, %c0_2] : memref<96x96xf32, #tpu.memory_space<vmem>>, vector<96x96xf32>
    %cst = arith.constant dense<0.000000e+00> : vector<16x96xf32>
    %2 = tpu.matmul %0, %1, %cst {dimension_numbers = #tpu.dot_dimension_numbers<[1], [0], [0], [1], [0, 0, 1, 1], [], []>} : vector<16x96xf32>, vector<96x96xf32>, vector<16x96xf32> -> vector<16x96xf32>
    %c0_3 = arith.constant 0 : index
    %c0_4 = arith.constant 0 : index
    %3 = vector.load %arg3[%c0_3, %c0_4] : memref<1x96xf32, #tpu.memory_space<vmem>>, vector<1x96xf32>
    %4 = vector.broadcast %3 : vector<1x96xf32> to vector<16x96xf32>
    %5 = arith.addf %2, %4 : vector<16x96xf32>
    %6 = vector.extract_strided_slice %5 {offsets = [0, 0], sizes = [16, 32], strides = [1, 1]} : vector<16x96xf32> to vector<16x32xf32>
    %7 = vector.extract_strided_slice %5 {offsets = [0, 32], sizes = [16, 32], strides = [1, 1]} : vector<16x96xf32> to vector<16x32xf32>
    %8 = vector.extract_strided_slice %5 {offsets = [0, 64], sizes = [16, 32], strides = [1, 1]} : vector<16x96xf32> to vector<16x32xf32>
    %9 = vector.extract_strided_slice %6 {offsets = [0, 0], sizes = [8, 8], strides = [1, 1]} : vector<16x32xf32> to vector<8x8xf32>
    %10 = vector.extract_strided_slice %7 {offsets = [0, 0], sizes = [8, 8], strides = [1, 1]} : vector<16x32xf32> to vector<8x8xf32>
    %11 = vector.extract_strided_slice %8 {offsets = [0, 0], sizes = [8, 8], strides = [1, 1]} : vector<16x32xf32> to vector<8x8xf32>
    %cst_5 = arith.constant dense<0.000000e+00> : vector<8x8xf32>
    %12 = tpu.matmul %9, %10, %cst_5 {dimension_numbers = #tpu.dot_dimension_numbers<[1], [1], [0], [0], [0, 0, 1, 0], [], []>} : vector<8x8xf32>, vector<8x8xf32>, vector<8x8xf32> -> vector<8x8xf32>
    %cst_6 = arith.constant dense<0xFF800000> : vector<8xf32>
    %13 = vector.multi_reduction <maximumf>, %12, %cst_6 [1] : vector<8x8xf32> to vector<8xf32>
    %14 = vector.shape_cast %13 : vector<8xf32> to vector<8x1xf32>
    %15 = vector.broadcast %14 : vector<8x1xf32> to vector<8x8xf32>
    %16 = arith.subf %12, %15 : vector<8x8xf32>
    %17 = math.exp %16 : vector<8x8xf32>
    %cst_7 = arith.constant dense<0.000000e+00> : vector<8xf32>
    %18 = vector.multi_reduction <add>, %17, %cst_7 [1] : vector<8x8xf32> to vector<8xf32>
    %19 = vector.shape_cast %18 : vector<8xf32> to vector<8x1xf32>
    %20 = tpu.reciprocal %19 {approx = true} : vector<8x1xf32> -> vector<8x1xf32>
    %21 = vector.broadcast %20 : vector<8x1xf32> to vector<8x8xf32>
    %22 = arith.mulf %17, %21 : vector<8x8xf32>
    %cst_8 = arith.constant dense<0.000000e+00> : vector<8x8xf32>
    %23 = tpu.matmul %22, %11, %cst_8 {dimension_numbers = #tpu.dot_dimension_numbers<[1], [0], [0], [1], [0, 0, 1, 1], [], []>} : vector<8x8xf32>, vector<8x8xf32>, vector<8x8xf32> -> vector<8x8xf32>
    %c0_9 = arith.constant 0 : index
    %c0_10 = arith.constant 0 : index
    %24 = vector.load %arg7[%c0_9, %c0_10] : memref<16x32xf32, #tpu.memory_space<vmem>>, vector<8x8xf32>
    tpu.vector_store %arg7[%c0_9, %c0_10], %23 {strides = array<i32>} : memref<16x32xf32, #tpu.memory_space<vmem>>, vector<8x8xf32>,
    %25 = vector.extract_strided_slice %6 {offsets = [0, 8], sizes = [8, 8], strides = [1, 1]} : vector<16x32xf32> to vector<8x8xf32>
    %26 = vector.extract_strided_slice %7 {offsets = [0, 8], sizes = [8, 8], strides = [1, 1]} : vector<16x32xf32> to vector<8x8xf32>
    %27 = vector.extract_strided_slice %8 {offsets = [0, 8], sizes = [8, 8], strides = [1, 1]} : vector<16x32xf32> to vector<8x8xf32>
    %cst_11 = arith.constant dense<0.000000e+00> : vector<8x8xf32>
    %28 = tpu.matmul %25, %26, %cst_11 {dimension_numbers = #tpu.dot_dimension_numbers<[1], [1], [0], [0], [0, 0, 1, 0], [], []>} : vector<8x8xf32>, vector<8x8xf32>, vector<8x8xf32> -> vector<8x8xf32>
    %cst_12 = arith.constant dense<0xFF800000> : vector<8xf32>
    %29 = vector.multi_reduction <maximumf>, %28, %cst_12 [1] : vector<8x8xf32> to vector<8xf32>
    %30 = vector.shape_cast %29 : vector<8xf32> to vector<8x1xf32>
    %31 = vector.broadcast %30 : vector<8x1xf32> to vector<8x8xf32>
    %32 = arith.subf %28, %31 : vector<8x8xf32>
    %33 = math.exp %32 : vector<8x8xf32>
    %cst_13 = arith.constant dense<0.000000e+00> : vector<8xf32>
    %34 = vector.multi_reduction <add>, %33, %cst_13 [1] : vector<8x8xf32> to vector<8xf32>
    %35 = vector.shape_cast %34 : vector<8xf32> to vector<8x1xf32>
    %36 = tpu.reciprocal %35 {approx = true} : vector<8x1xf32> -> vector<8x1xf32>
    %37 = vector.broadcast %36 : vector<8x1xf32> to vector<8x8xf32>
    %38 = arith.mulf %33, %37 : vector<8x8xf32>
    %cst_14 = arith.constant dense<0.000000e+00> : vector<8x8xf32>
    %39 = tpu.matmul %38, %27, %cst_14 {dimension_numbers = #tpu.dot_dimension_numbers<[1], [0], [0], [1], [0, 0, 1, 1], [], []>} : vector<8x8xf32>, vector<8x8xf32>, vector<8x8xf32> -> vector<8x8xf32>
    %c0_15 = arith.constant 0 : index
    %c8 = arith.constant 8 : index
    %40 = vector.load %arg7[%c0_15, %c8] : memref<16x32xf32, #tpu.memory_space<vmem>>, vector<8x8xf32>
    tpu.vector_store %arg7[%c0_15, %c8], %39 {strides = array<i32>} : memref<16x32xf32, #tpu.memory_space<vmem>>, vector<8x8xf32>,
    %41 = vector.extract_strided_slice %6 {offsets = [0, 16], sizes = [8, 8], strides = [1, 1]} : vector<16x32xf32> to vector<8x8xf32>
    %42 = vector.extract_strided_slice %7 {offsets = [0, 16], sizes = [8, 8], strides = [1, 1]} : vector<16x32xf32> to vector<8x8xf32>
    %43 = vector.extract_strided_slice %8 {offsets = [0, 16], sizes = [8, 8], strides = [1, 1]} : vector<16x32xf32> to vector<8x8xf32>
    %cst_16 = arith.constant dense<0.000000e+00> : vector<8x8xf32>
    %44 = tpu.matmul %41, %42, %cst_16 {dimension_numbers = #tpu.dot_dimension_numbers<[1], [1], [0], [0], [0, 0, 1, 0], [], []>} : vector<8x8xf32>, vector<8x8xf32>, vector<8x8xf32> -> vector<8x8xf32>
    %cst_17 = arith.constant dense<0xFF800000> : vector<8xf32>
    %45 = vector.multi_reduction <maximumf>, %44, %cst_17 [1] : vector<8x8xf32> to vector<8xf32>
    %46 = vector.shape_cast %45 : vector<8xf32> to vector<8x1xf32>
    %47 = vector.broadcast %46 : vector<8x1xf32> to vector<8x8xf32>
    %48 = arith.subf %44, %47 : vector<8x8xf32>
    %49 = math.exp %48 : vector<8x8xf32>
    %cst_18 = arith.constant dense<0.000000e+00> : vector<8xf32>
    %50 = vector.multi_reduction <add>, %49, %cst_18 [1] : vector<8x8xf32> to vector<8xf32>
    %51 = vector.shape_cast %50 : vector<8xf32> to vector<8x1xf32>
    %52 = tpu.reciprocal %51 {approx = true} : vector<8x1xf32> -> vector<8x1xf32>
    %53 = vector.broadcast %52 : vector<8x1xf32> to vector<8x8xf32>
    %54 = arith.mulf %49, %53 : vector<8x8xf32>
    %cst_19 = arith.constant dense<0.000000e+00> : vector<8x8xf32>
    %55 = tpu.matmul %54, %43, %cst_19 {dimension_numbers = #tpu.dot_dimension_numbers<[1], [0], [0], [1], [0, 0, 1, 1], [], []>} : vector<8x8xf32>, vector<8x8xf32>, vector<8x8xf32> -> vector<8x8xf32>
    %c0_20 = arith.constant 0 : index
    %c16 = arith.constant 16 : index
    %56 = vector.load %arg7[%c0_20, %c16] : memref<16x32xf32, #tpu.memory_space<vmem>>, vector<8x8xf32>
    tpu.vector_store %arg7[%c0_20, %c16], %55 {strides = array<i32>} : memref<16x32xf32, #tpu.memory_space<vmem>>, vector<8x8xf32>,
    %57 = vector.extract_strided_slice %6 {offsets = [0, 24], sizes = [8, 8], strides = [1, 1]} : vector<16x32xf32> to vector<8x8xf32>
    %58 = vector.extract_strided_slice %7 {offsets = [0, 24], sizes = [8, 8], strides = [1, 1]} : vector<16x32xf32> to vector<8x8xf32>
    %59 = vector.extract_strided_slice %8 {offsets = [0, 24], sizes = [8, 8], strides = [1, 1]} : vector<16x32xf32> to vector<8x8xf32>
    %cst_21 = arith.constant dense<0.000000e+00> : vector<8x8xf32>
    %60 = tpu.matmul %57, %58, %cst_21 {dimension_numbers = #tpu.dot_dimension_numbers<[1], [1], [0], [0], [0, 0, 1, 0], [], []>} : vector<8x8xf32>, vector<8x8xf32>, vector<8x8xf32> -> vector<8x8xf32>
    %cst_22 = arith.constant dense<0xFF800000> : vector<8xf32>
    %61 = vector.multi_reduction <maximumf>, %60, %cst_22 [1] : vector<8x8xf32> to vector<8xf32>
    %62 = vector.shape_cast %61 : vector<8xf32> to vector<8x1xf32>
    %63 = vector.broadcast %62 : vector<8x1xf32> to vector<8x8xf32>
    %64 = arith.subf %60, %63 : vector<8x8xf32>
    %65 = math.exp %64 : vector<8x8xf32>
    %cst_23 = arith.constant dense<0.000000e+00> : vector<8xf32>
    %66 = vector.multi_reduction <add>, %65, %cst_23 [1] : vector<8x8xf32> to vector<8xf32>
    %67 = vector.shape_cast %66 : vector<8xf32> to vector<8x1xf32>
    %68 = tpu.reciprocal %67 {approx = true} : vector<8x1xf32> -> vector<8x1xf32>
    %69 = vector.broadcast %68 : vector<8x1xf32> to vector<8x8xf32>
    %70 = arith.mulf %65, %69 : vector<8x8xf32>
    %cst_24 = arith.constant dense<0.000000e+00> : vector<8x8xf32>
    %71 = tpu.matmul %70, %59, %cst_24 {dimension_numbers = #tpu.dot_dimension_numbers<[1], [0], [0], [1], [0, 0, 1, 1], [], []>} : vector<8x8xf32>, vector<8x8xf32>, vector<8x8xf32> -> vector<8x8xf32>
    %c0_25 = arith.constant 0 : index
    %c24 = arith.constant 24 : index
    %72 = vector.load %arg7[%c0_25, %c24] : memref<16x32xf32, #tpu.memory_space<vmem>>, vector<8x8xf32>
    tpu.vector_store %arg7[%c0_25, %c24], %71 {strides = array<i32>} : memref<16x32xf32, #tpu.memory_space<vmem>>, vector<8x8xf32>,
    %73 = vector.extract_strided_slice %6 {offsets = [8, 0], sizes = [8, 8], strides = [1, 1]} : vector<16x32xf32> to vector<8x8xf32>
    %74 = vector.extract_strided_slice %7 {offsets = [8, 0], sizes = [8, 8], strides = [1, 1]} : vector<16x32xf32> to vector<8x8xf32>
    %75 = vector.extract_strided_slice %8 {offsets = [8, 0], sizes = [8, 8], strides = [1, 1]} : vector<16x32xf32> to vector<8x8xf32>
    %cst_26 = arith.constant dense<0.000000e+00> : vector<8x8xf32>
    %76 = tpu.matmul %73, %74, %cst_26 {dimension_numbers = #tpu.dot_dimension_numbers<[1], [1], [0], [0], [0, 0, 1, 0], [], []>} : vector<8x8xf32>, vector<8x8xf32>, vector<8x8xf32> -> vector<8x8xf32>
    %cst_27 = arith.constant dense<0xFF800000> : vector<8xf32>
    %77 = vector.multi_reduction <maximumf>, %76, %cst_27 [1] : vector<8x8xf32> to vector<8xf32>
    %78 = vector.shape_cast %77 : vector<8xf32> to vector<8x1xf32>
    %79 = vector.broadcast %78 : vector<8x1xf32> to vector<8x8xf32>
    %80 = arith.subf %76, %79 : vector<8x8xf32>
    %81 = math.exp %80 : vector<8x8xf32>
    %cst_28 = arith.constant dense<0.000000e+00> : vector<8xf32>
    %82 = vector.multi_reduction <add>, %81, %cst_28 [1] : vector<8x8xf32> to vector<8xf32>
    %83 = vector.shape_cast %82 : vector<8xf32> to vector<8x1xf32>
    %84 = tpu.reciprocal %83 {approx = true} : vector<8x1xf32> -> vector<8x1xf32>
    %85 = vector.broadcast %84 : vector<8x1xf32> to vector<8x8xf32>
    %86 = arith.mulf %81, %85 : vector<8x8xf32>
    %cst_29 = arith.constant dense<0.000000e+00> : vector<8x8xf32>
    %87 = tpu.matmul %86, %75, %cst_29 {dimension_numbers = #tpu.dot_dimension_numbers<[1], [0], [0], [1], [0, 0, 1, 1], [], []>} : vector<8x8xf32>, vector<8x8xf32>, vector<8x8xf32> -> vector<8x8xf32>
    %c8_30 = arith.constant 8 : index
    %c0_31 = arith.constant 0 : index
    %88 = vector.load %arg7[%c8_30, %c0_31] : memref<16x32xf32, #tpu.memory_space<vmem>>, vector<8x8xf32>
    tpu.vector_store %arg7[%c8_30, %c0_31], %87 {strides = array<i32>} : memref<16x32xf32, #tpu.memory_space<vmem>>, vector<8x8xf32>,
    %89 = vector.extract_strided_slice %6 {offsets = [8, 8], sizes = [8, 8], strides = [1, 1]} : vector<16x32xf32> to vector<8x8xf32>
    %90 = vector.extract_strided_slice %7 {offsets = [8, 8], sizes = [8, 8], strides = [1, 1]} : vector<16x32xf32> to vector<8x8xf32>
    %91 = vector.extract_strided_slice %8 {offsets = [8, 8], sizes = [8, 8], strides = [1, 1]} : vector<16x32xf32> to vector<8x8xf32>
    %cst_32 = arith.constant dense<0.000000e+00> : vector<8x8xf32>
    %92 = tpu.matmul %89, %90, %cst_32 {dimension_numbers = #tpu.dot_dimension_numbers<[1], [1], [0], [0], [0, 0, 1, 0], [], []>} : vector<8x8xf32>, vector<8x8xf32>, vector<8x8xf32> -> vector<8x8xf32>
    %cst_33 = arith.constant dense<0xFF800000> : vector<8xf32>
    %93 = vector.multi_reduction <maximumf>, %92, %cst_33 [1] : vector<8x8xf32> to vector<8xf32>
    %94 = vector.shape_cast %93 : vector<8xf32> to vector<8x1xf32>
    %95 = vector.broadcast %94 : vector<8x1xf32> to vector<8x8xf32>
    %96 = arith.subf %92, %95 : vector<8x8xf32>
    %97 = math.exp %96 : vector<8x8xf32>
    %cst_34 = arith.constant dense<0.000000e+00> : vector<8xf32>
    %98 = vector.multi_reduction <add>, %97, %cst_34 [1] : vector<8x8xf32> to vector<8xf32>
    %99 = vector.shape_cast %98 : vector<8xf32> to vector<8x1xf32>
    %100 = tpu.reciprocal %99 {approx = true} : vector<8x1xf32> -> vector<8x1xf32>
    %101 = vector.broadcast %100 : vector<8x1xf32> to vector<8x8xf32>
    %102 = arith.mulf %97, %101 : vector<8x8xf32>
    %cst_35 = arith.constant dense<0.000000e+00> : vector<8x8xf32>
    %103 = tpu.matmul %102, %91, %cst_35 {dimension_numbers = #tpu.dot_dimension_numbers<[1], [0], [0], [1], [0, 0, 1, 1], [], []>} : vector<8x8xf32>, vector<8x8xf32>, vector<8x8xf32> -> vector<8x8xf32>
    %c8_36 = arith.constant 8 : index
    %c8_37 = arith.constant 8 : index
    %104 = vector.load %arg7[%c8_36, %c8_37] : memref<16x32xf32, #tpu.memory_space<vmem>>, vector<8x8xf32>
    tpu.vector_store %arg7[%c8_36, %c8_37], %103 {strides = array<i32>} : memref<16x32xf32, #tpu.memory_space<vmem>>, vector<8x8xf32>,
    %105 = vector.extract_strided_slice %6 {offsets = [8, 16], sizes = [8, 8], strides = [1, 1]} : vector<16x32xf32> to vector<8x8xf32>
    %106 = vector.extract_strided_slice %7 {offsets = [8, 16], sizes = [8, 8], strides = [1, 1]} : vector<16x32xf32> to vector<8x8xf32>
    %107 = vector.extract_strided_slice %8 {offsets = [8, 16], sizes = [8, 8], strides = [1, 1]} : vector<16x32xf32> to vector<8x8xf32>
    %cst_38 = arith.constant dense<0.000000e+00> : vector<8x8xf32>
    %108 = tpu.matmul %105, %106, %cst_38 {dimension_numbers = #tpu.dot_dimension_numbers<[1], [1], [0], [0], [0, 0, 1, 0], [], []>} : vector<8x8xf32>, vector<8x8xf32>, vector<8x8xf32> -> vector<8x8xf32>
    %cst_39 = arith.constant dense<0xFF800000> : vector<8xf32>
    %109 = vector.multi_reduction <maximumf>, %108, %cst_39 [1] : vector<8x8xf32> to vector<8xf32>
    %110 = vector.shape_cast %109 : vector<8xf32> to vector<8x1xf32>
    %111 = vector.broadcast %110 : vector<8x1xf32> to vector<8x8xf32>
    %112 = arith.subf %108, %111 : vector<8x8xf32>
    %113 = math.exp %112 : vector<8x8xf32>
    %cst_40 = arith.constant dense<0.000000e+00> : vector<8xf32>
    %114 = vector.multi_reduction <add>, %113, %cst_40 [1] : vector<8x8xf32> to vector<8xf32>
    %115 = vector.shape_cast %114 : vector<8xf32> to vector<8x1xf32>
    %116 = tpu.reciprocal %115 {approx = true} : vector<8x1xf32> -> vector<8x1xf32>
    %117 = vector.broadcast %116 : vector<8x1xf32> to vector<8x8xf32>
    %118 = arith.mulf %113, %117 : vector<8x8xf32>
    %cst_41 = arith.constant dense<0.000000e+00> : vector<8x8xf32>
    %119 = tpu.matmul %118, %107, %cst_41 {dimension_numbers = #tpu.dot_dimension_numbers<[1], [0], [0], [1], [0, 0, 1, 1], [], []>} : vector<8x8xf32>, vector<8x8xf32>, vector<8x8xf32> -> vector<8x8xf32>
    %c8_42 = arith.constant 8 : index
    %c16_43 = arith.constant 16 : index
    %120 = vector.load %arg7[%c8_42, %c16_43] : memref<16x32xf32, #tpu.memory_space<vmem>>, vector<8x8xf32>
    tpu.vector_store %arg7[%c8_42, %c16_43], %119 {strides = array<i32>} : memref<16x32xf32, #tpu.memory_space<vmem>>, vector<8x8xf32>,
    %121 = vector.extract_strided_slice %6 {offsets = [8, 24], sizes = [8, 8], strides = [1, 1]} : vector<16x32xf32> to vector<8x8xf32>
    %122 = vector.extract_strided_slice %7 {offsets = [8, 24], sizes = [8, 8], strides = [1, 1]} : vector<16x32xf32> to vector<8x8xf32>
    %123 = vector.extract_strided_slice %8 {offsets = [8, 24], sizes = [8, 8], strides = [1, 1]} : vector<16x32xf32> to vector<8x8xf32>
    %cst_44 = arith.constant dense<0.000000e+00> : vector<8x8xf32>
    %124 = tpu.matmul %121, %122, %cst_44 {dimension_numbers = #tpu.dot_dimension_numbers<[1], [1], [0], [0], [0, 0, 1, 0], [], []>} : vector<8x8xf32>, vector<8x8xf32>, vector<8x8xf32> -> vector<8x8xf32>
    %cst_45 = arith.constant dense<0xFF800000> : vector<8xf32>
    %125 = vector.multi_reduction <maximumf>, %124, %cst_45 [1] : vector<8x8xf32> to vector<8xf32>
    %126 = vector.shape_cast %125 : vector<8xf32> to vector<8x1xf32>
    %127 = vector.broadcast %126 : vector<8x1xf32> to vector<8x8xf32>
    %128 = arith.subf %124, %127 : vector<8x8xf32>
    %129 = math.exp %128 : vector<8x8xf32>
    %cst_46 = arith.constant dense<0.000000e+00> : vector<8xf32>
    %130 = vector.multi_reduction <add>, %129, %cst_46 [1] : vector<8x8xf32> to vector<8xf32>
    %131 = vector.shape_cast %130 : vector<8xf32> to vector<8x1xf32>
    %132 = tpu.reciprocal %131 {approx = true} : vector<8x1xf32> -> vector<8x1xf32>
    %133 = vector.broadcast %132 : vector<8x1xf32> to vector<8x8xf32>
    %134 = arith.mulf %129, %133 : vector<8x8xf32>
    %cst_47 = arith.constant dense<0.000000e+00> : vector<8x8xf32>
    %135 = tpu.matmul %134, %123, %cst_47 {dimension_numbers = #tpu.dot_dimension_numbers<[1], [0], [0], [1], [0, 0, 1, 1], [], []>} : vector<8x8xf32>, vector<8x8xf32>, vector<8x8xf32> -> vector<8x8xf32>
    %c8_48 = arith.constant 8 : index
    %c24_49 = arith.constant 24 : index
    %136 = vector.load %arg7[%c8_48, %c24_49] : memref<16x32xf32, #tpu.memory_space<vmem>>, vector<8x8xf32>
    tpu.vector_store %arg7[%c8_48, %c24_49], %135 {strides = array<i32>} : memref<16x32xf32, #tpu.memory_space<vmem>>, vector<8x8xf32>,
    %c0_50 = arith.constant 0 : index
    %c0_51 = arith.constant 0 : index
    %137 = vector.load %arg7[%c0_50, %c0_51] : memref<16x32xf32, #tpu.memory_space<vmem>>, vector<16x32xf32>
    %c0_52 = arith.constant 0 : index
    %c0_53 = arith.constant 0 : index
    %138 = vector.load %arg4[%c0_52, %c0_53] : memref<32x32xf32, #tpu.memory_space<vmem>>, vector<32x32xf32>
    %cst_54 = arith.constant dense<0.000000e+00> : vector<16x32xf32>
    %139 = tpu.matmul %137, %138, %cst_54 {dimension_numbers = #tpu.dot_dimension_numbers<[1], [0], [0], [1], [0, 0, 1, 1], [], []>} : vector<16x32xf32>, vector<32x32xf32>, vector<16x32xf32> -> vector<16x32xf32>
    %c0_55 = arith.constant 0 : index
    %c0_56 = arith.constant 0 : index
    %140 = vector.load %arg5[%c0_55, %c0_56] : memref<1x32xf32, #tpu.memory_space<vmem>>, vector<1x32xf32>
    %141 = vector.broadcast %140 : vector<1x32xf32> to vector<16x32xf32>
    %142 = arith.addf %139, %141 : vector<16x32xf32>
    %c0_57 = arith.constant 0 : index
    %c0_58 = arith.constant 0 : index
    %143 = vector.load %arg6[%c0_57, %c0_58] : memref<16x32xf32, #tpu.memory_space<vmem>>, vector<16x32xf32>
    tpu.vector_store %arg6[%c0_57, %c0_58], %142 {strides = array<i32>} : memref<16x32xf32, #tpu.memory_space<vmem>>, vector<16x32xf32>,
    return
  }
  func.func @transform_0(%arg0: i32) -> (i32, i32) {
    %c0_i32 = arith.constant 0 : i32
    %c0_i32_0 = arith.constant 0 : i32
    %c0_i32_1 = arith.constant 0 : i32
    return %c0_i32, %c0_i32_0 : i32, i32
  }
  func.func @transform_1(%arg0: i32) -> (i32, i32) {
    %c0_i32 = arith.constant 0 : i32
    %c0_i32_0 = arith.constant 0 : i32
    %c0_i32_1 = arith.constant 0 : i32
    return %c0_i32, %c0_i32_0 : i32, i32
  }
  func.func @transform_2(%arg0: i32) -> (i32, i32) {
    %c0_i32 = arith.constant 0 : i32
    %c0_i32_0 = arith.constant 0 : i32
    %c0_i32_1 = arith.constant 0 : i32
    return %c0_i32, %c0_i32_0 : i32, i32
  }
  func.func @transform_3(%arg0: i32) -> (i32, i32) {
    %c0_i32 = arith.constant 0 : i32
    %c0_i32_0 = arith.constant 0 : i32
    %c0_i32_1 = arith.constant 0 : i32
    return %c0_i32, %c0_i32_0 : i32, i32
  }
  func.func @transform_4(%arg0: i32) -> (i32, i32) {
    %c0_i32 = arith.constant 0 : i32
    %c0_i32_0 = arith.constant 0 : i32
    %c0_i32_1 = arith.constant 0 : i32
    return %c0_i32, %c0_i32_0 : i32, i32
  }
  func.func @transform_5(%arg0: i32) -> (i32, i32) {
    %c0_i32 = arith.constant 0 : i32
    %c0_i32_0 = arith.constant 0 : i32
    %c0_i32_1 = arith.constant 0 : i32
    return %c0_i32, %c0_i32_0 : i32, i32
  }
}

</mosaic_0001>

<bundles_post_ra>
// kernel: multi_head_attention.1
= control target key start
LH: loop header
LB: loop body
LE: loop exit
PB: predicated region body
PF: predicated region fallthrough
CT: control target
= control target key end

     0   :  { %10 = vsyncpa [#allocation4], 0  ;;  %s2147_s0 = inlined_call_operand.vmem [shape: f32[16,96], index: 0, kind: input, shape index: {}]   ;;  %s2148_s1 = inlined_call_operand.hbm [shape: f32[96,96], index: 1, kind: input, shape index: {}]   ;;  %s2149_s2 = inlined_call_operand.vmem [shape: f32[1,96], index: 2, kind: input, shape index: {}]   ;;  %s2150_s3 = inlined_call_operand.vmem [shape: f32[32,32], index: 3, kind: input, shape index: {}]   ;;  %s2151_s4 = inlined_call_operand.vmem [shape: f32[1,32], index: 4, kind: input, shape index: {}]   ;;  %s2152_s5 = inlined_call_operand.hbm [shape: f32[16,32], index: 5, kind: output, shape index: {}]  }
   0x1   :  { %11 = vsyncpa [#allocation5], 0  ;;  %s1901_s18 = smov [#allocation3]  }
   0x2   :  { %s19_s19 = sshll.u32 %s1901_s18, 4  ;;  %s20_s19 = int_to_ptr.vmem [resolvable:$true] %s19_s19 }
   0x3   :  { %s1865_s20 = scalar_lea.vmem %s20_s19, 1536  ;;  %p1870_p1 = scmp.lt.s32.totalorder %s20_s19, %s20_s19 }
   0x4   :  { %p1866_p0 = scmp.ne.s32.totalorder %s20_s19, %s1865_s20  ;;  %p1871_p2 = scmp.lt.s32.totalorder %s1865_s20, %s1865_s20 }
   0x6   :  { %p1872_p3 = por %p1871_p2, %p1870_p1 }
   0x8   :  { %p1873_p4 = pnand %p1872_p3, %p1866_p0 }
   0xa   :  { %1876 = shalt.err (!%p1873_p4)
}
   0xb   :  { %s1902_s21 = smov 128   ;;  %s1903_s22 = smov 8  }
   0xc   :  { %25 = dma.hbm_to_vmem [thread:$0]  %s2148_s1, 1536, %s20_s19, [#allocation4], %s1902_s21, %s1902_s21, %s1903_s22  }
   0xd   :  { %1897 = dma.done.wait [#allocation4], 1536  }
   0xe   :  { %1898 = vsyncadd [#allocation4], 4294965760  ;;  %v48_v0 = vld [vmem:[#allocation3 + $0x58] sm:$0xff]  ;;  %v47_v1 = vld [vmem:[#allocation3 + $0x50] sm:$0xff]  ;;  %vm56_vm0 = vcmask 785408   ;;  %v1904_v14 = vmov 0.0  }
   0xf   :  { %1688 = vmatprep.subr.mxu0 %v48_v0  ;;  %v46_v2 = vld [vmem:[#allocation3 + $0x48] sm:$0xff]  ;;  %v45_v3 = vld [vmem:[#allocation3 + $0x40] sm:$0xff]  ;;  %v35_v4 = vld [vmem:[%s2147_s0] sm:$0xff]  ;;  %1715 = vmatprep.subr.mxu1 %v1904_v14  ;;  %vm1905_vm1 = vmmov 0   ;;  %s1907_s30 = smov 96   ;;  %s1908_s6 = smov 88  }
  0x10   :  { %1689 = vmatpush3.msra.mxu0 %v48_v0  ;;  %1712 = vmatprep.mubr.msk.f32.mxu0 %vm56_vm0, %v35_v4  ;;  %v44_v5 = vld [vmem:[#allocation3 + $0x38] sm:$0xff]  ;;  %v43_v6 = vld [vmem:[#allocation3 + $0x30] sm:$0xff]  ;;  %v42_v7 = vld [vmem:[#allocation3 + $0x28] sm:$0xff]  ;;  %vm141_vm2 = vcmask 64512   ;;  %s1910_s7 = smov 120   ;;  %s1911_s8 = smov 80  }
  0x11   :  { %1690 = vmatprep.subr.mxu0 %v47_v1  ;;  %v41_v8 = vld [vmem:[#allocation3 + $0x20] sm:$0xff]  ;;  %v40_v9 = vld [vmem:[#allocation3 + $0x18] sm:$0xff]  ;;  %v39_v10 = vld [vmem:[#allocation3 + $0x10] sm:$0xff]  ;;  %1717 = vmatprep.mubr.msk.f32.mxu1 %vm1905_vm1, %v1904_v14  ;;  %s1912_s9 = smov 112   ;;  %s1913_s10 = smov 48   ;;  %vm473_vm3 = vcmask 130112  }
  0x12   :  { %1691 = vmatpush3.msra.mxu0 %v47_v1  ;;  %v38_v11 = vld [vmem:[#allocation3 + $0x8] sm:$0xff]  ;;  %v37_v12 = vld [vmem:[#allocation3] sm:$0xff]  ;;  %v36_v13 = vld [vmem:[%s2147_s0 + $0x8] sm:$0xff]  ;;  %s1906_s0 = smov 64   ;;  %s1914_s11 = smov 72   ;;  %vm644_vm4 = vcmask 195712  }
  0x13   :  { %1692 = vmatprep.subr.mxu0 %v46_v2  ;;  %v1606_v15 = vld [vmem:[%s2149_s2] ss:$0 sm:$0xff]  ;;  %s1909_s2 = smov 56   ;;  %s1915_s12 = smov 104   ;;  %vm815_vm5 = vcmask 261312   ;;  %vm1505_vm6 = vcmask 261120  }
  0x14   :  { %1693 = vmatpush3.msra.mxu0 %v46_v2  ;;  %s1916_s13 = smov 40   ;;  %s1917_s14 = smov 16  }
  0x15   :  { %1694 = vmatprep.subr.mxu0 %v45_v3  ;;  %s1918_s15 = smov 24   ;;  %s1919_s1 = smov [#allocation6]  }
  0x16   :  { %1695 = vmatpush3.msra.mxu0 %v45_v3  ;;  %s1594_s27 = sshll.u32 %s1919_s1, 4  ;;  %s1595_s27 = int_to_ptr.vmem [resolvable:$true] %s1594_s27 }
  0x17   :  { %1696 = vmatprep.subr.mxu0 %v44_v5  ;;  %s1877_s28 = scalar_lea.vmem %s1595_s27, 256  ;;  %p1882_p6 = scmp.lt.s32.totalorder %s1595_s27, %s1595_s27 }
  0x18   :  { %1697 = vmatpush3.msra.mxu0 %v44_v5  ;;  %p1878_p5 = scmp.ne.s32.totalorder %s1595_s27, %s1877_s28  ;;  %p1883_p7 = scmp.lt.s32.totalorder %s1877_s28, %s1877_s28 }
  0x19   :  { %1698 = vmatprep.subr.mxu0 %v43_v6 }
  0x1a   :  { %1699 = vmatpush3.msra.mxu0 %v43_v6  ;;  %p1884_p8 = por %p1883_p7, %p1882_p6 }
  0x1b   :  { %1700 = vmatprep.subr.mxu0 %v42_v7 }
  0x1c   :  { %1701 = vmatpush3.msra.mxu0 %v42_v7  ;;  %p1885_p9 = pnand %p1884_p8, %p1878_p5 }
  0x1d   :  { %1702 = vmatprep.subr.mxu0 %v41_v8 }
  0x1e   :  { %1703 = vmatpush3.msra.mxu0 %v41_v8 }
  0x1f   :  { %1704 = vmatprep.subr.mxu0 %v40_v9 }
  0x20   :  { %1705 = vmatpush3.msra.mxu0 %v40_v9 }
  0x21   :  { %1706 = vmatprep.subr.mxu0 %v39_v10 }
  0x22   :  { %1707 = vmatpush3.msra.mxu0 %v39_v10 }
  0x23   :  { %1708 = vmatprep.subr.mxu0 %v38_v11 }
  0x24   :  { %1709 = vmatpush3.msra.mxu0 %v38_v11 }
  0x25   :  { %1710 = vmatprep.subr.mxu0 %v37_v12 }
  0x26   :  { %1711 = vmatpush3.msra.mxu0 %v37_v12 }
  0x27   :  { %1713 = vmatmul.mubr.msk.f32.vlgmr.msra.gmra.mxu0 %vm56_vm0, %v36_v13  ;;  %1755 = vmatprep.subr.mxu0 %v1904_v14 }
  0x28   :  { %1757 = vmatprep.mubr.msk.f32.mxu0 %vm1905_vm1, %v1904_v14 }
  0xe7   :  { %v1714_v16 = vpop.f32.mrf.mxu0 }
  0xe8   :  { %v1973_v17 = vadd.f32 %v1714_v16, %v1606_v15 }
  0xe9   :  { %v129_v18 = vpop.f32.mrf.mxu0 }
  0xea   :  { %v1975_v19 = vadd.f32 %v1606_v15, %v129_v18 }
  0xec   :  { %227 = vrot.lane.b32.xlu1 %v1975_v19, %s1906_s0  ;;  %139 = vrot.lane.b32.xlu0 %v1975_v19, %s1907_s30 }
  0xf0   :  { %306 = vrot.lane.b32.xlu1 %v1975_v19, %s1908_s6 }
 0x15e   :  { %v140_v20 = vpop.permute.xlu0 %139  ;;  %v228_v21 = vpop.permute.xlu1 %227 }
 0x15f   :  { %1716 = vmatpush3.xpose.msk.msra.mxu1 %vm141_vm2, %v140_v20 }
 0x160   :  { %1720 = vmatprep.subr.mxu1 %v1904_v14 }
 0x162   :  { %1718 = vmatmul.mubr.msk.f32.vlgmr.msra.gmra.mxu1 %vm141_vm2, %v1975_v19  ;;  %v307_v30 = vpop.permute.xlu1 %306 }
 0x163   :  { %1721 = vmatpush3.msra.mxu1 %v228_v21  ;;  %1722 = vmatprep.mubr.msk.f32.mxu1 %vm1905_vm1, %v1904_v14 }
 0x164   :  { %1725 = vmatprep.subr.mxu1 %v1904_v14 }
 0x222   :  { %v212_v22 = vpop.f32.mrf.mxu1 }
 0x223   :  { %v216_v23 = vsel %vm141_vm2, %v212_v22, -inf }
 0x224   :  { %217 = vmax.xlane.f32.xlu0 %v216_v23  ;;  %v1719_v24 = vpop.f32.mrf.mxu1 }
 0x23a   :  { %393 = vrot.lane.b32.xlu0 %v1975_v19, %s1909_s2 }
 0x2ad   :  { %v218_v25 = vpop.xlane.xlu0 %217 }
 0x2ae   :  { %v219_v26 = vsub.f32 %v212_v22, %v218_v25 }
 0x2b0   :  { %v220_v27 = vmul.f32 1.442695, %v219_v26 }
 0x2b1   :  { %v394_v35 = vpop.permute.xlu0 %393 }
 0x2b2   :  { %1825 = vpow2.f32 %v220_v27 }
 0x2bf   :  { %v1826_v28 = vpop.eup %1825 }
 0x2c0   :  { %v222_v29 = vsel %vm141_vm2, %v1826_v28, 0.0 }
 0x2c1   :  { %223 = vadd.xlane.f32.xlu1 %v222_v29 }
 0x2d2   :  { %304 = vrot.lane.b32.xlu1 %v1975_v19, %s1910_s7 }
 0x34a   :  { %v224_v31 = vpop.xlane.xlu1 %223 }
 0x34b   :  { %1827 = vrcp.f32 %v224_v31 }
 0x34e   :  { %v305_v34 = vpop.permute.xlu1 %304 }
 0x358   :  { %v1828_v32 = vpop.eup %1827 }
 0x359   :  { %v226_v33 = vmul.f32 %v1828_v32, %v1826_v28 }
 0x35b   :  { %1723 = vmatmul.mubr.msk.f32.vlgmr.msra.gmra.mxu1 %vm141_vm2, %v226_v33 }
 0x35c   :  { %1726 = vmatpush3.xpose.msk.msra.mxu1 %vm141_vm2, %v307_v30  ;;  %1727 = vmatprep.mubr.msk.f32.mxu1 %vm1905_vm1, %v1904_v14 }
 0x35d   :  { %1730 = vmatprep.subr.mxu1 %v1904_v14 }
 0x35f   :  { %1728 = vmatmul.mubr.msk.f32.vlgmr.msra.gmra.mxu1 %vm141_vm2, %v305_v34 }
 0x360   :  { %1731 = vmatpush3.msra.mxu1 %v394_v35  ;;  %1732 = vmatprep.mubr.msk.f32.mxu1 %vm1905_vm1, %v1904_v14 }
 0x361   :  { %1735 = vmatprep.subr.mxu1 %v1904_v14 }
 0x41b   :  { %v299_v36 = vpop.f32.mrf.mxu1 }
 0x41c   :  { %303 = vst.msk [vmem:[#allocation2] sm:$0xff] %vm141_vm2, %v299_v36 }
 0x41d   :  { %v1724_v37 = vpop.f32.mrf.mxu1 }
 0x41f   :  { %v378_v38 = vpop.f32.mrf.mxu1 }
 0x420   :  { %v382_v39 = vsel %vm141_vm2, %v378_v38, -inf }
 0x421   :  { %383 = vmax.xlane.f32.xlu1 %v382_v39  ;;  %v1729_v40 = vpop.f32.mrf.mxu1 }
 0x4aa   :  { %v384_v41 = vpop.xlane.xlu1 %383 }
 0x4ab   :  { %v385_v42 = vsub.f32 %v378_v38, %v384_v41 }
 0x4ad   :  { %v386_v43 = vmul.f32 1.442695, %v385_v42 }
 0x4af   :  { %1829 = vpow2.f32 %v386_v43 }
 0x4bc   :  { %v1830_v44 = vpop.eup %1829 }
 0x4bd   :  { %v388_v45 = vsel %vm141_vm2, %v1830_v44, 0.0 }
 0x4be   :  { %389 = vadd.xlane.f32.xlu0 %v388_v45 }
 0x4d4   :  { %477 = vrot.lane.b32.xlu0 %v1975_v19, %s1911_s8 }
 0x4d8   :  { %475 = vrot.lane.b32.xlu0 %v1975_v19, %s1912_s9 }
 0x547   :  { %v390_v46 = vpop.xlane.xlu0 %389 }
 0x548   :  { %1831 = vrcp.f32 %v390_v46 }
 0x54b   :  { %v478_v48 = vpop.permute.xlu0 %477 }
 0x54f   :  { %v476_v50 = vpop.permute.xlu0 %475 }
 0x555   :  { %v1832_v47 = vpop.eup %1831 }
 0x556   :  { %v392_v49 = vmul.f32 %v1832_v47, %v1830_v44 }
 0x558   :  { %1733 = vmatmul.mubr.msk.f32.vlgmr.msra.gmra.mxu1 %vm141_vm2, %v392_v49 }
 0x559   :  { %1736 = vmatpush3.xpose.msk.msra.mxu1 %vm141_vm2, %v478_v48  ;;  %1737 = vmatprep.mubr.msk.f32.mxu1 %vm1905_vm1, %v1904_v14 }
 0x55a   :  { %1740 = vmatprep.subr.mxu1 %v1904_v14 }
 0x55c   :  { %1738 = vmatmul.mubr.msk.f32.vlgmr.msra.gmra.mxu1 %vm141_vm2, %v476_v50 }
 0x55d   :  { %1742 = vmatprep.mubr.msk.f32.mxu1 %vm1905_vm1, %v1904_v14 }
 0x618   :  { %v2019_v51 = vpop.f32.mrf.mxu1 }
 0x61a   :  { %v1734_v52 = vpop.f32.mrf.mxu1 }
 0x61c   :  { %v549_v53 = vpop.f32.mrf.mxu1 }
 0x61d   :  { %v553_v54 = vsel %vm141_vm2, %v549_v53, -inf }
 0x61e   :  { %554 = vmax.xlane.f32.xlu1 %v553_v54  ;;  %v1739_v55 = vpop.f32.mrf.mxu1 }
 0x62f   :  { %564 = vrot.lane.b32.xlu1 %v1975_v19, %s1913_s10 }
 0x633   :  { %648 = vrot.lane.b32.xlu1 %v1975_v19, %s1914_s11 }
 0x637   :  { %646 = vrot.lane.b32.xlu1 %v1975_v19, %s1915_s12 }
 0x63b   :  { %818 = vrot.lane.b32.xlu1 %v1973_v17, %s1907_s30 }
 0x63f   :  { %984 = vrot.lane.b32.xlu1 %v1973_v17, %s1908_s6 }
 0x643   :  { %1154 = vrot.lane.b32.xlu1 %v1973_v17, %s1911_s8 }
 0x647   :  { %1152 = vrot.lane.b32.xlu1 %v1973_v17, %s1912_s9 }
 0x64b   :  { %1324 = vrot.lane.b32.xlu1 %v1973_v17, %s1914_s11 }
 0x64f   :  { %1322 = vrot.lane.b32.xlu1 %v1973_v17, %s1915_s12 }
 0x6a7   :  { %v555_v56 = vpop.xlane.xlu1 %554 }
 0x6a8   :  { %v556_v57 = vsub.f32 %v549_v53, %v555_v56 }
 0x6aa   :  { %v557_v58 = vmul.f32 1.442695, %v556_v57 }
 0x6ab   :  { %v565_v59 = vpop.permute.xlu1 %564 }
 0x6ac   :  { %1833 = vpow2.f32 %v557_v58  ;;  %1741 = vmatpush3.msra.mxu1 %v565_v59 }
 0x6ad   :  { %1745 = vmatprep.subr.mxu1 %v1904_v14 }
 0x6af   :  { %v649_v60 = vpop.permute.xlu1 %648 }
 0x6b3   :  { %v647_v61 = vpop.permute.xlu1 %646 }
 0x6b7   :  { %v819_v62 = vpop.permute.xlu1 %818 }
 0x6b8   :  { %1756 = vmatpush3.xpose.msk.msra.mxu0 %vm141_vm2, %v819_v62 }
 0x6b9   :  { %v1834_v63 = vpop.eup %1833  ;;  %1765 = vmatprep.subr.mxu0 %v1904_v14 }
 0x6ba   :  { %v559_v0 = vsel %vm141_vm2, %v1834_v63, 0.0 }
 0x6bb   :  { %560 = vadd.xlane.f32.xlu0 %v559_v0  ;;  %1758 = vmatmul.mubr.msk.f32.vlgmr.msra.gmra.mxu0 %vm141_vm2, %v1973_v17  ;;  %v985_v1 = vpop.permute.xlu1 %984 }
 0x6bc   :  { %1766 = vmatpush3.xpose.msk.msra.mxu0 %vm141_vm2, %v985_v1  ;;  %1767 = vmatprep.mubr.msk.f32.mxu0 %vm1905_vm1, %v1904_v14 }
 0x6bd   :  { %1775 = vmatprep.subr.mxu0 %v1904_v14 }
 0x6bf   :  { %v1155_v2 = vpop.permute.xlu1 %1154 }
 0x6c3   :  { %v1153_v3 = vpop.permute.xlu1 %1152 }
 0x6c7   :  { %v1325_v6 = vpop.permute.xlu1 %1324 }
 0x6cb   :  { %v1323_v7 = vpop.permute.xlu1 %1322 }
 0x6d1   :  { %982 = vrot.lane.b32.xlu0 %v1973_v17, %s1910_s7 }
 0x744   :  { %v561_v4 = vpop.xlane.xlu0 %560 }
 0x745   :  { %1835 = vrcp.f32 %v561_v4 }
 0x748   :  { %v983_v5 = vpop.permute.xlu0 %982 }
 0x749   :  { %1768 = vmatmul.mubr.msk.f32.vlgmr.msra.gmra.mxu0 %vm141_vm2, %v983_v5 }
 0x74a   :  { %1776 = vmatpush3.xpose.msk.msra.mxu0 %vm141_vm2, %v1155_v2  ;;  %1777 = vmatprep.mubr.msk.f32.mxu0 %vm1905_vm1, %v1904_v14 }
 0x74b   :  { %1785 = vmatprep.subr.mxu0 %v1904_v14 }
 0x74d   :  { %1778 = vmatmul.mubr.msk.f32.vlgmr.msra.gmra.mxu0 %vm141_vm2, %v1153_v3 }
 0x74e   :  { %1786 = vmatpush3.xpose.msk.msra.mxu0 %vm141_vm2, %v1325_v6  ;;  %1787 = vmatprep.mubr.msk.f32.mxu0 %vm1905_vm1, %v1904_v14 }
 0x751   :  { %1788 = vmatmul.mubr.msk.f32.vlgmr.msra.gmra.mxu0 %vm141_vm2, %v1323_v7 }
 0x752   :  { %v1836_v8 = vpop.eup %1835 }
 0x753   :  { %v563_v9 = vmul.f32 %v1836_v8, %v1834_v63 }
 0x755   :  { %1743 = vmatmul.mubr.msk.f32.vlgmr.msra.gmra.mxu1 %vm141_vm2, %v563_v9 }
 0x756   :  { %1746 = vmatpush3.xpose.msk.msra.mxu1 %vm141_vm2, %v649_v60  ;;  %1747 = vmatprep.mubr.msk.f32.mxu1 %vm1905_vm1, %v1904_v14 }
 0x757   :  { %1750 = vmatprep.subr.mxu1 %v1904_v14 }
 0x759   :  { %1748 = vmatmul.mubr.msk.f32.vlgmr.msra.gmra.mxu1 %vm141_vm2, %v647_v61 }
 0x75a   :  { %1752 = vmatprep.mubr.msk.f32.mxu1 %vm1905_vm1, %v1904_v14 }
 0x77b   :  { %v890_v10 = vpop.f32.mrf.mxu0 }
 0x77c   :  { %v894_v11 = vsel %vm141_vm2, %v890_v10, -inf }
 0x77d   :  { %895 = vmax.xlane.f32.xlu0 %v894_v11  ;;  %v1759_v12 = vpop.f32.mrf.mxu0 }
 0x806   :  { %v896_v13 = vpop.xlane.xlu0 %895 }
 0x807   :  { %v897_v15 = vsub.f32 %v890_v10, %v896_v13 }
 0x809   :  { %v898_v16 = vmul.f32 1.442695, %v897_v15  ;;  %v1056_v18 = vpop.f32.mrf.mxu0  ;;  %v1497_v15 = vld [vmem:[%s2150_s3 + $0x18] sm:$0xff] }
 0x80a   :  { %v1060_v20 = vsel %vm141_vm2, %v1056_v18, -inf  ;;  %1795 = vmatprep.subr.mxu0 %v1497_v15 }
 0x80b   :  { %1837 = vpow2.f32 %v898_v16  ;;  %1061 = vmax.xlane.f32.xlu0 %v1060_v20  ;;  %v1769_v21 = vpop.f32.mrf.mxu0  ;;  %v1496_v16 = vld [vmem:[%s2150_s3 + $0x10] sm:$0xff]  ;;  %1796 = vmatpush3.msra.mxu0 %v1497_v15 }
 0x80c   :  { %1797 = vmatprep.subr.mxu0 %v1496_v16  ;;  %v1494_v21 = vld [vmem:[%s2150_s3] sm:$0xff] }
 0x80d   :  { %v1226_v22 = vpop.f32.mrf.mxu0  ;;  %1798 = vmatpush3.msra.mxu0 %v1496_v16 }
 0x80e   :  { %v1230_v34 = vsel %vm141_vm2, %v1226_v22, -inf }
 0x80f   :  { %v1779_v23 = vpop.f32.mrf.mxu0 }
 0x811   :  { %v1396_v24 = vpop.f32.mrf.mxu0 }
 0x812   :  { %v1400_v25 = vsel %vm141_vm2, %v1396_v24, -inf }
 0x813   :  { %1401 = vmax.xlane.f32.xlu0 %v1400_v25  ;;  %v1789_v26 = vpop.f32.mrf.mxu0 }
 0x815   :  { %v636_v27 = vpop.f32.mrf.mxu1 }
 0x817   :  { %v1744_v28 = vpop.f32.mrf.mxu1 }
 0x818   :  { %v2068_v29 = vpop.eup %1837 }
 0x819   :  { %v720_v30 = vpop.f32.mrf.mxu1  ;;  %v900_v31 = vsel %vm141_vm2, %v2068_v29, 0.0 }
 0x81a   :  { %901 = vadd.xlane.f32.xlu0 %v900_v31  ;;  %v724_v32 = vsel %vm141_vm2, %v720_v30, -inf }
 0x81b   :  { %725 = vmax.xlane.f32.xlu1 %v724_v32  ;;  %v1749_v33 = vpop.f32.mrf.mxu1 }
 0x81c   :  { %v1633_v33 = vld [vmem:[%s2151_s4] ss:$0 sm:$0xff] }
 0x81f   :  { %1231 = vmax.xlane.f32.xlu1 %v1230_v34 }
 0x894   :  { %v1062_v35 = vpop.xlane.xlu0 %1061 }
 0x895   :  { %v1063_v36 = vsub.f32 %v1056_v18, %v1062_v35  ;;  %v1495_v18 = vld [vmem:[%s2150_s3 + $0x8] sm:$0xff] }
 0x896   :  { %1799 = vmatprep.subr.mxu0 %v1495_v18 }
 0x897   :  { %v1064_v37 = vmul.f32 1.442695, %v1063_v36  ;;  %1800 = vmatpush3.msra.mxu0 %v1495_v18 }
 0x898   :  { %1801 = vmatprep.subr.mxu0 %v1494_v21 }
 0x899   :  { %1839 = vpow2.f32 %v1064_v37  ;;  %1802 = vmatpush3.msra.mxu0 %v1494_v21 }
 0x89c   :  { %v1402_v38 = vpop.xlane.xlu0 %1401 }
 0x89d   :  { %v1403_v39 = vsub.f32 %v1396_v24, %v1402_v38 }
 0x89f   :  { %v1404_v40 = vmul.f32 1.442695, %v1403_v39 }
 0x8a1   :  { %1841 = vpow2.f32 %v1404_v40 }
 0x8a4   :  { %v726_v41 = vpop.xlane.xlu1 %725 }
 0x8a5   :  { %v727_v52 = vsub.f32 %v720_v30, %v726_v41 }
 0x8a6   :  { %v2074_v42 = vpop.eup %1839 }
 0x8a7   :  { %v1066_v43 = vsel %vm141_vm2, %v2074_v42, 0.0  ;;  %v728_v53 = vmul.f32 1.442695, %v727_v52 }
 0x8a8   :  { %1067 = vadd.xlane.f32.xlu1 %v1066_v43  ;;  %v1232_v44 = vpop.xlane.xlu1 %1231 }
 0x8a9   :  { %v1233_v45 = vsub.f32 %v1226_v22, %v1232_v44 }
 0x8ab   :  { %v1234_v46 = vmul.f32 1.442695, %v1233_v45 }
 0x8ad   :  { %1843 = vpow2.f32 %v1234_v46 }
 0x8ae   :  { %v2078_v47 = vpop.eup %1841  ;;  %1845 = vpow2.f32 %v728_v53 }
 0x8af   :  { %v1406_v48 = vsel %vm141_vm2, %v2078_v47, 0.0 }
 0x8b0   :  { %1407 = vadd.xlane.f32.xlu1 %v1406_v48 }
 0x8ba   :  { %v1844_v49 = vpop.eup %1843 }
 0x8bb   :  { %v1236_v50 = vsel %vm141_vm2, %v1844_v49, 0.0  ;;  %v1846_v54 = vpop.eup %1845 }
 0x8bc   :  { %1237 = vadd.xlane.f32.xlu0 %v1236_v50  ;;  %v730_v55 = vsel %vm141_vm2, %v1846_v54, 0.0 }
 0x8c1   :  { %905 = vrot.lane.b32.xlu1 %v1973_v17, %s1906_s0 }
 0x8d2   :  { %735 = vrot.lane.b32.xlu0 %v1975_v19, %s1916_s13  ;;  %v902_v19 = vpop.xlane.xlu0 %901 }
 0x8d6   :  { %1241 = vrot.lane.b32.xlu0 %v1973_v17, %s1913_s10 }
 0x8da   :  { %470 = vrot.lane.b32.xlu0 %v2019_v51, %s1903_s22 }
 0x8e5   :  { %731 = vadd.xlane.f32.xlu1 %v730_v55 }
 0x8f6   :  { %1071 = vrot.lane.b32.xlu1 %v1973_v17, %s1909_s2 }
 0x8fa   :  { %1411 = vrot.lane.b32.xlu1 %v1973_v17, %s1916_s13 }
 0x8fe   :  { %641 = vrot.lane.b32.xlu1 %v636_v27, %s1917_s14 }
 0x931   :  { %v1068_v59 = vpop.xlane.xlu1 %1067 }
 0x939   :  { %v1408_v60 = vpop.xlane.xlu1 %1407 }
 0x93d   :  { %v906_v61 = vpop.permute.xlu1 %905 }
 0x945   :  { %v1238_v56 = vpop.xlane.xlu0 %1237 }
 0x949   :  { %v736_v57 = vpop.permute.xlu0 %735 }
 0x94a   :  { %1751 = vmatpush3.msra.mxu1 %v736_v57 }
 0x94b   :  { %1760 = vmatprep.subr.mxu1 %v1904_v14 }
 0x94d   :  { %v1242_v58 = vpop.permute.xlu0 %1241 }
 0x951   :  { %v471_v51 = vpop.permute.xlu0 %470 }
 0x952   :  { %474 = vst.msk [vmem:[#allocation2] sm:$0xff] %vm473_vm3, %v471_v51 }
 0x96e   :  { %v732_v62 = vpop.xlane.xlu1 %731 }
 0x96f   :  { %1847 = vrcp.f32 %v732_v62 }
 0x970   :  { %1849 = vrcp.f32 %v902_v19 }
 0x971   :  { %1851 = vrcp.f32 %v1068_v59 }
 0x972   :  { %v1072_v17 = vpop.permute.xlu1 %1071  ;;  %1853 = vrcp.f32 %v1238_v56 }
 0x973   :  { %1855 = vrcp.f32 %v1408_v60 }
 0x976   :  { %v1412_v63 = vpop.permute.xlu1 %1411 }
 0x97a   :  { %v642_v0 = vpop.permute.xlu1 %641 }
 0x97b   :  { %645 = vst.msk [vmem:[#allocation2] sm:$0xff] %vm644_vm4, %v642_v0 }
 0x97c   :  { %v1848_v1 = vpop.eup %1847 }
 0x97d   :  { %v734_v2 = vmul.f32 %v1848_v1, %v1846_v54  ;;  %v1850_v3 = vpop.eup %1849 }
 0x97e   :  { %v904_v4 = vmul.f32 %v1850_v3, %v2068_v29  ;;  %v1852_v5 = vpop.eup %1851 }
 0x97f   :  { %1753 = vmatmul.mubr.msk.f32.vlgmr.msra.gmra.mxu1 %vm141_vm2, %v734_v2  ;;  %v1070_v6 = vmul.f32 %v1852_v5, %v2074_v42  ;;  %v1854_v7 = vpop.eup %1853 }
 0x980   :  { %1761 = vmatpush3.msra.mxu1 %v906_v61  ;;  %1762 = vmatprep.mubr.msk.f32.mxu1 %vm1905_vm1, %v1904_v14  ;;  %v1240_v8 = vmul.f32 %v1854_v7, %v1844_v49  ;;  %v1856_v9 = vpop.eup %1855 }
 0x981   :  { %1770 = vmatprep.subr.mxu1 %v1904_v14  ;;  %v1410_v10 = vmul.f32 %v1856_v9, %v2078_v47 }
 0x983   :  { %1763 = vmatmul.mubr.msk.f32.vlgmr.msra.gmra.mxu1 %vm141_vm2, %v904_v4 }
 0x984   :  { %1771 = vmatpush3.msra.mxu1 %v1072_v17  ;;  %1772 = vmatprep.mubr.msk.f32.mxu1 %vm1905_vm1, %v1904_v14 }
 0x985   :  { %1780 = vmatprep.subr.mxu1 %v1904_v14 }
 0x987   :  { %1773 = vmatmul.mubr.msk.f32.vlgmr.msra.gmra.mxu1 %vm141_vm2, %v1070_v6 }
 0x988   :  { %1781 = vmatpush3.msra.mxu1 %v1242_v58  ;;  %1782 = vmatprep.mubr.msk.f32.mxu1 %vm1905_vm1, %v1904_v14 }
 0x989   :  { %1790 = vmatprep.subr.mxu1 %v1904_v14 }
 0x98b   :  { %1783 = vmatmul.mubr.msk.f32.vlgmr.msra.gmra.mxu1 %vm141_vm2, %v1240_v8 }
 0x98c   :  { %1791 = vmatpush3.msra.mxu1 %v1412_v63  ;;  %1792 = vmatprep.mubr.msk.f32.mxu1 %vm1905_vm1, %v1904_v14 }
 0x98f   :  { %1793 = vmatmul.mubr.msk.f32.vlgmr.msra.gmra.mxu1 %vm141_vm2, %v1410_v10 }
 0xa3f   :  { %v807_v11 = vpop.f32.mrf.mxu1 }
 0xa40   :  { %812 = vrot.lane.b32.xlu1 %v807_v11, %s1918_s15 }
 0xa41   :  { %v1754_v12 = vpop.f32.mrf.mxu1 }
 0xa43   :  { %v977_v13 = vpop.f32.mrf.mxu1 }
 0xa44   :  { %981 = vst.msk [vmem:[#allocation2 + $0x8] sm:$0xff] %vm141_vm2, %v977_v13 }
 0xa45   :  { %v1764_v14 = vpop.f32.mrf.mxu1 }
 0xa47   :  { %v1143_v20 = vpop.f32.mrf.mxu1 }
 0xa48   :  { %1148 = vrot.lane.b32.xlu0 %v1143_v20, %s1903_s22 }
 0xa49   :  { %v1774_v22 = vpop.f32.mrf.mxu1 }
 0xa4b   :  { %v1313_v23 = vpop.f32.mrf.mxu1 }
 0xa4c   :  { %1318 = vrot.lane.b32.xlu0 %v1313_v23, %s1917_s14 }
 0xa4d   :  { %v1784_v24 = vpop.f32.mrf.mxu1 }
 0xa4f   :  { %v1483_v25 = vpop.f32.mrf.mxu1 }
 0xa50   :  { %1488 = vrot.lane.b32.xlu1 %v1483_v25, %s1918_s15 }
 0xa51   :  { %v1794_v26 = vpop.f32.mrf.mxu1 }
 0xab2   :  { %v813_v27 = vpop.permute.xlu1 %812 }
 0xab3   :  { %816 = vst.msk [vmem:[#allocation2] sm:$0xff] %vm815_vm5, %v813_v27 }
 0xaba   :  { %v1149_v28 = vpop.permute.xlu0 %1148  ;;  %v1492_v29 = vld [vmem:[#allocation2] sm:$0xff] }
 0xabb   :  { %1151 = vst.msk [vmem:[#allocation2 + $0x8] sm:$0xff] %vm473_vm3, %v1149_v28  ;;  %1803 = vmatprep.mubr.msk.f32.mxu0 %vm1505_vm6, %v1492_v29 }
 0xabe   :  { %v1319_v30 = vpop.permute.xlu0 %1318 }
 0xabf   :  { %1321 = vst.msk [vmem:[#allocation2 + $0x8] sm:$0xff] %vm644_vm4, %v1319_v30 }
 0xac2   :  { %v1489_v31 = vpop.permute.xlu1 %1488 }
 0xac3   :  { %1491 = vst.msk [vmem:[#allocation2 + $0x8] sm:$0xff] %vm815_vm5, %v1489_v31 }
 0xaca   :  { %v1493_v32 = vld [vmem:[#allocation2 + $0x8] sm:$0xff] }
 0xacb   :  { %1804 = vmatmul.mubr.msk.f32.vlgmr.msra.gmra.mxu0 %vm1505_vm6, %v1493_v32 }
 0xb8b   :  { %v1805_v34 = vpop.f32.mrf.mxu0 }
 0xb8c   :  { %v1584_v35 = vadd.f32 %v1805_v34, %v1633_v33 }
 0xb8d   :  { %v1578_v36 = vpop.f32.mrf.mxu0 }
 0xb8e   :  { %1588 = vst.msk [vmem:[#allocation6 + $0x8] sm:$0xff] %vm1505_vm6, %v1584_v35  ;;  %v1579_v37 = vadd.f32 %v1633_v33, %v1578_v36 }
 0xb90   :  { %1587 = vst.msk [vmem:[#allocation6] sm:$0xff] %vm1505_vm6, %v1579_v37 }
 0xb91   :  { %1888 = shalt.err (!%p1885_p9)
}
 0xb92   :  { %1600 = dma.vmem_to_hbm [thread:$0]  %s1595_s27, 256, %s2152_s5, [#allocation5], %s1902_s21, %s1902_s21, %s1903_s22  }
 0xb93   :  { %1899 = dma.done.wait [#allocation5], 256  }
 0xb94   :  { %1900 = vsyncadd [#allocation5], 4294967040 }
 0xb95   :  { %1604 = vsyncpa [#allocation4], 1 }
 0xb96   :  { %1605 = vsyncpa [#allocation5], 1 }

</bundles_post_ra>
